<compile_context>
chip_gen: v7x
topology: tpu7x:2x2x1
jax: 0.10.0
libtpu: 0.0.40
codegen_flags: <defaults>
</compile_context>

<pallas_src>
import functools

import jax
import jax.numpy as jnp
from jax.experimental import pallas as pl
from jax.experimental.pallas import tpu as pltpu

K_IN = 784        # 1 * 28 * 28
K_PAD = 896       # 784 padded up to 7*128 (zero-padded; no ragged tail vreg)
N_OUT = 10
N_OUT_PAD = 128   # lane-dense output; avoids masked 10-wide partial stores
TB_MAX = 256      # max batch tile: 256 rows fills the MXU; multiple of 16 (bf16)
                  # VMEM/tile @256: x 2x448KiB + out 2x128KiB + weights ~0.5MiB ->
                  # well under the scoped default on v5e (16 MiB) and v7x (32 MiB).


def mlp_kernel(x_ref, w1_ref, b1_ref, w2_ref, b2_ref, w3_ref, b3_ref, o_ref):
    # x tile (TB, 896) bf16; weights bf16; biases f32; MXU accumulates in f32,
    # bias-add + ReLU run on the f32 accumulator (VPU).
    h1 = jnp.dot(x_ref[...], w1_ref[...], preferred_element_type=jnp.float32)
    h1 = jnp.maximum(h1 + b1_ref[...], 0.0)                      # (TB, 128) f32
    h2 = jnp.dot(h1.astype(jnp.bfloat16), w2_ref[...],
                 preferred_element_type=jnp.float32)
    h2 = jnp.maximum(h2 + b2_ref[...], 0.0)                      # (TB, 64)  f32
    h3 = jnp.dot(h2.astype(jnp.bfloat16), w3_ref[...],
                 preferred_element_type=jnp.float32)
    o_ref[...] = (h3 + b3_ref[...]).astype(o_ref.dtype)          # (TB, 128) f32


@functools.partial(jax.jit, static_argnames=())
def simple_net_forward(x, params):
    """x: (B, 1, 28, 28) float32 (NCHW). Returns (B, 10) float32 logits."""
    w1, b1, w2, b2, w3, b3 = params
    B = x.shape[0]
    xf = x.reshape(B, -1)                                        # (B, 784)

    # Adaptive batch tile: don't pad tiny batches up to 256 rows.
    tb = min(TB_MAX, pl.cdiv(B, 16) * 16)                        # multiple of 16
    Bp = pl.cdiv(B, tb) * tb

    # Pad batch to a multiple of tb and contraction dim 784 -> 896 with zeros.
    xf = jnp.pad(xf, ((0, Bp - B), (0, K_PAD - K_IN)))
    w1p = jnp.pad(w1, ((0, K_PAD - K_IN), (0, 0)))
    # Lane-dense final layer: zero-pad output dim 10 -> 128.
    w3p = jnp.pad(w3, ((0, 0), (0, N_OUT_PAD - N_OUT)))
    b3p = jnp.pad(b3, ((0, 0), (0, N_OUT_PAD - N_OUT)))

    # bf16 activations/weights (halves x HBM traffic), f32 accumulation in-kernel.
    xb = xf.astype(jnp.bfloat16)
    w1b = w1p.astype(jnp.bfloat16)
    w2b = w2.astype(jnp.bfloat16)
    w3b = w3p.astype(jnp.bfloat16)

    const2d = lambda i: (0, 0)   # weights/biases: DMA'd once, VMEM-resident

    out = pl.pallas_call(
        mlp_kernel,
        out_shape=jax.ShapeDtypeStruct((Bp, N_OUT_PAD), jnp.float32),
        grid=(Bp // tb,),
        in_specs=[
            pl.BlockSpec((tb, K_PAD), lambda i: (i, 0)),         # streamed x tile
            pl.BlockSpec(w1b.shape, const2d),                    # (896, 128) bf16
            pl.BlockSpec(b1.shape, const2d),                     # (1, 128)   f32
            pl.BlockSpec(w2b.shape, const2d),                    # (128, 64)  bf16
            pl.BlockSpec(b2.shape, const2d),                     # (1, 64)    f32
            pl.BlockSpec(w3b.shape, const2d),                    # (64, 128)  bf16
            pl.BlockSpec(b3p.shape, const2d),                    # (1, 128)   f32
        ],
        out_specs=pl.BlockSpec((tb, N_OUT_PAD), lambda i: (i, 0)),
        compiler_params=pltpu.CompilerParams(
            dimension_semantics=("parallel",),   # shard batch across TCs on v7x
        ),
    )(xb, w1b, b1, w2b, b2, w3b, b3p)

    return out[:B, :N_OUT]


def init_params(key):
    """Deterministic init mimicking PyTorch nn.Linear (uniform +/- 1/sqrt(fan_in))."""
    dims = [(784, 128), (128, 64), (64, 10)]
    params = []
    for i, (fan_in, fan_out) in enumerate(dims):
        kw, kb = jax.random.split(jax.random.fold_in(key, i))
        bound = 1.0 / jnp.sqrt(fan_in)
        w = jax.random.uniform(kw, (fan_in, fan_out), jnp.float32, -bound, bound)
        b = jax.random.uniform(kb, (1, fan_out), jnp.float32, -bound, bound)
        params += [w, b]
    return tuple(params)


if __name__ == "__main__":
    key = jax.random.PRNGKey(0)
    k_x, k_p = jax.random.split(key)

    B = 8  # small demo batch; kernel pads to one tb=16 tile internally
    x = jax.random.normal(k_x, (B, 1, 28, 28), dtype=jnp.float32)  # NCHW
    params = init_params(k_p)

    out = simple_net_forward(x, params)
    jax.block_until_ready(out)

    # Sanity check against a plain-JAX f32 reference (kernel runs bf16 inputs
    # with f32 accumulation, so use a looser tolerance).
    w1, b1, w2, b2, w3, b3 = params
    xf = x.reshape(B, -1)
    ref = jnp.maximum(xf @ w1 + b1, 0.0)
    ref = jnp.maximum(ref @ w2 + b2, 0.0)
    ref = ref @ w3 + b3

    assert out.shape == (B, 10)
    assert bool(jnp.all(jnp.isfinite(out)))
    assert jnp.allclose(out, ref, atol=5e-2, rtol=5e-2), float(
        jnp.max(jnp.abs(out - ref)))

    print("KERNEL_OK")
</pallas_src>

<mosaic_0001>
module attributes {stable_mosaic.version = 11 : i64} {
  func.func @mlp_kernel(%arg0: i32, %arg1: memref<16x896xbf16, #tpu.memory_space<vmem>>, %arg2: memref<896x128xbf16, #tpu.memory_space<vmem>>, %arg3: memref<1x128xf32, #tpu.memory_space<vmem>>, %arg4: memref<128x64xbf16, #tpu.memory_space<vmem>>, %arg5: memref<1x64xf32, #tpu.memory_space<vmem>>, %arg6: memref<64x128xbf16, #tpu.memory_space<vmem>>, %arg7: memref<1x128xf32, #tpu.memory_space<vmem>>, %arg8: memref<16x128xf32, #tpu.memory_space<vmem>>) attributes {dimension_semantics = [#tpu.dimension_semantics<parallel>], iteration_bounds = array<i64: 1>, scalar_prefetch = 0 : i64, scratch_operands = 0 : i64, tpu.core_type = #tpu.core_type<tc>, window_params = [{transform_indices = @transform_0, window_bounds = array<i64: 16, 896>}, {pipeline_mode = #tpu.pipeline_mode<synchronous>, transform_indices = @transform_1, window_bounds = array<i64: 896, 128>}, {pipeline_mode = #tpu.pipeline_mode<synchronous>, transform_indices = @transform_2, window_bounds = array<i64: 1, 128>}, {pipeline_mode = #tpu.pipeline_mode<synchronous>, transform_indices = @transform_3, window_bounds = array<i64: 128, 64>}, {pipeline_mode = #tpu.pipeline_mode<synchronous>, transform_indices = @transform_4, window_bounds = array<i64: 1, 64>}, {pipeline_mode = #tpu.pipeline_mode<synchronous>, transform_indices = @transform_5, window_bounds = array<i64: 64, 128>}, {pipeline_mode = #tpu.pipeline_mode<synchronous>, transform_indices = @transform_6, window_bounds = array<i64: 1, 128>}, {transform_indices = @transform_7, window_bounds = array<i64: 16, 128>}]} {
    %c0 = arith.constant 0 : index
    %c0_0 = arith.constant 0 : index
    %0 = vector.load %arg1[%c0, %c0_0] : memref<16x896xbf16, #tpu.memory_space<vmem>>, vector<16x896xbf16>
    %c0_1 = arith.constant 0 : index
    %c0_2 = arith.constant 0 : index
    %1 = vector.load %arg2[%c0_1, %c0_2] : memref<896x128xbf16, #tpu.memory_space<vmem>>, vector<896x128xbf16>
    %cst = arith.constant dense<0.000000e+00> : vector<16x128xf32>
    %2 = tpu.matmul %0, %1, %cst {dimension_numbers = #tpu.dot_dimension_numbers<[1], [0], [0], [1], [0, 0, 1, 1], [], []>} : vector<16x896xbf16>, vector<896x128xbf16>, vector<16x128xf32> -> vector<16x128xf32>
    %c0_3 = arith.constant 0 : index
    %c0_4 = arith.constant 0 : index
    %3 = vector.load %arg3[%c0_3, %c0_4] : memref<1x128xf32, #tpu.memory_space<vmem>>, vector<1x128xf32>
    %4 = vector.broadcast %3 : vector<1x128xf32> to vector<16x128xf32>
    %5 = arith.addf %2, %4 : vector<16x128xf32>
    %cst_5 = arith.constant 0.000000e+00 : f32
    %6 = vector.broadcast %cst_5 : f32 to vector<16x128xf32>
    %7 = arith.maximumf %5, %6 : vector<16x128xf32>
    %8 = arith.truncf %7 : vector<16x128xf32> to vector<16x128xbf16>
    %c0_6 = arith.constant 0 : index
    %c0_7 = arith.constant 0 : index
    %9 = vector.load %arg4[%c0_6, %c0_7] : memref<128x64xbf16, #tpu.memory_space<vmem>>, vector<128x64xbf16>
    %cst_8 = arith.constant dense<0.000000e+00> : vector<16x64xf32>
    %10 = tpu.matmul %8, %9, %cst_8 {dimension_numbers = #tpu.dot_dimension_numbers<[1], [0], [0], [1], [0, 0, 1, 1], [], []>} : vector<16x128xbf16>, vector<128x64xbf16>, vector<16x64xf32> -> vector<16x64xf32>
    %c0_9 = arith.constant 0 : index
    %c0_10 = arith.constant 0 : index
    %11 = vector.load %arg5[%c0_9, %c0_10] : memref<1x64xf32, #tpu.memory_space<vmem>>, vector<1x64xf32>
    %12 = vector.broadcast %11 : vector<1x64xf32> to vector<16x64xf32>
    %13 = arith.addf %10, %12 : vector<16x64xf32>
    %cst_11 = arith.constant 0.000000e+00 : f32
    %14 = vector.broadcast %cst_11 : f32 to vector<16x64xf32>
    %15 = arith.maximumf %13, %14 : vector<16x64xf32>
    %16 = arith.truncf %15 : vector<16x64xf32> to vector<16x64xbf16>
    %c0_12 = arith.constant 0 : index
    %c0_13 = arith.constant 0 : index
    %17 = vector.load %arg6[%c0_12, %c0_13] : memref<64x128xbf16, #tpu.memory_space<vmem>>, vector<64x128xbf16>
    %cst_14 = arith.constant dense<0.000000e+00> : vector<16x128xf32>
    %18 = tpu.matmul %16, %17, %cst_14 {dimension_numbers = #tpu.dot_dimension_numbers<[1], [0], [0], [1], [0, 0, 1, 1], [], []>} : vector<16x64xbf16>, vector<64x128xbf16>, vector<16x128xf32> -> vector<16x128xf32>
    %c0_15 = arith.constant 0 : index
    %c0_16 = arith.constant 0 : index
    %19 = vector.load %arg7[%c0_15, %c0_16] : memref<1x128xf32, #tpu.memory_space<vmem>>, vector<1x128xf32>
    %20 = vector.broadcast %19 : vector<1x128xf32> to vector<16x128xf32>
    %21 = arith.addf %18, %20 : vector<16x128xf32>
    %c0_17 = arith.constant 0 : index
    %c0_18 = arith.constant 0 : index
    %22 = vector.load %arg8[%c0_17, %c0_18] : memref<16x128xf32, #tpu.memory_space<vmem>>, vector<16x128xf32>
    tpu.vector_store %arg8[%c0_17, %c0_18], %21 {strides = array<i32>} : memref<16x128xf32, #tpu.memory_space<vmem>>, vector<16x128xf32>,
    return
  }
  func.func @transform_0(%arg0: i32) -> (i32, i32) {
    %c0_i32 = arith.constant 0 : i32
    %c0_i32_0 = arith.constant 0 : i32
    return %arg0, %c0_i32 : i32, i32
  }
  func.func @transform_1(%arg0: i32) -> (i32, i32) {
    %c0_i32 = arith.constant 0 : i32
    %c0_i32_0 = arith.constant 0 : i32
    %c0_i32_1 = arith.constant 0 : i32
    return %c0_i32, %c0_i32_0 : i32, i32
  }
  func.func @transform_2(%arg0: i32) -> (i32, i32) {
    %c0_i32 = arith.constant 0 : i32
    %c0_i32_0 = arith.constant 0 : i32
    %c0_i32_1 = arith.constant 0 : i32
    return %c0_i32, %c0_i32_0 : i32, i32
  }
  func.func @transform_3(%arg0: i32) -> (i32, i32) {
    %c0_i32 = arith.constant 0 : i32
    %c0_i32_0 = arith.constant 0 : i32
    %c0_i32_1 = arith.constant 0 : i32
    return %c0_i32, %c0_i32_0 : i32, i32
  }
  func.func @transform_4(%arg0: i32) -> (i32, i32) {
    %c0_i32 = arith.constant 0 : i32
    %c0_i32_0 = arith.constant 0 : i32
    %c0_i32_1 = arith.constant 0 : i32
    return %c0_i32, %c0_i32_0 : i32, i32
  }
  func.func @transform_5(%arg0: i32) -> (i32, i32) {
    %c0_i32 = arith.constant 0 : i32
    %c0_i32_0 = arith.constant 0 : i32
    %c0_i32_1 = arith.constant 0 : i32
    return %c0_i32, %c0_i32_0 : i32, i32
  }
  func.func @transform_6(%arg0: i32) -> (i32, i32) {
    %c0_i32 = arith.constant 0 : i32
    %c0_i32_0 = arith.constant 0 : i32
    %c0_i32_1 = arith.constant 0 : i32
    return %c0_i32, %c0_i32_0 : i32, i32
  }
  func.func @transform_7(%arg0: i32) -> (i32, i32) {
    %c0_i32 = arith.constant 0 : i32
    %c0_i32_0 = arith.constant 0 : i32
    return %arg0, %c0_i32 : i32, i32
  }
}

</mosaic_0001>

<bundles_post_ra>
// kernel: simple_net_forward.1
= control target key start
LH: loop header
LB: loop body
LE: loop exit
PB: predicated region body
PF: predicated region fallthrough
CT: control target
= control target key end

     0   :  { %v1198_v38 = vmov 0.0   ;;  %vm1199_vm0 = vmmov 0   ;;  %vm847_vm1 = vcmask 523264   ;;  %s1506_s1 = inlined_call_operand.vmem [shape: bf16[896,128], index: 1, kind: input, shape index: {}]   ;;  %s1507_s0 = inlined_call_operand.vmem [shape: bf16[16,896], index: 0, kind: input, shape index: {}]   ;;  %s1508_s3 = inlined_call_operand.vmem [shape: bf16[128,64], index: 3, kind: input, shape index: {}]   ;;  %s1509_s5 = inlined_call_operand.vmem [shape: bf16[64,128], index: 5, kind: input, shape index: {}]   ;;  %s1510_s2 = inlined_call_operand.vmem [shape: f32[1,128], index: 2, kind: input, shape index: {}]   ;;  %s1511_s4 = inlined_call_operand.vmem [shape: f32[1,64], index: 4, kind: input, shape index: {}]   ;;  %s1512_s6 = inlined_call_operand.vmem [shape: f32[1,128], index: 6, kind: input, shape index: {}]   ;;  %s1513_s7 = inlined_call_operand.vmem [shape: f32[16,128], index: 7, kind: output, shape index: {}]  }
   0x1   :  { %v1120_v0 = vld [vmem:[%s1506_s1 + $0x40] sm:$0xff]   ;;  %v1124_v4 = vld [vmem:[%s1506_s1 + $0x48] sm:$0xff]   ;;  %v1128_v8 = vld [vmem:[%s1506_s1 + $0x50] sm:$0xff]  }
   0x2   :  { %v1121_v1 = vld [vmem:[%s1506_s1] sm:$0xff]   ;;  %977 = vmatprep.subr.bf16.mxu0 %v1120_v0  ;;  %v1125_v5 = vld [vmem:[%s1506_s1 + $0x8] sm:$0xff]   ;;  %v1129_v9 = vld [vmem:[%s1506_s1 + $0x10] sm:$0xff]  }
   0x3   :  { %v1122_v2 = vld [vmem:[%s1506_s1 + $0xc0] sm:$0xff]   ;;  %978 = vmatpush3.bf16.msra.mxu0 %v1121_v1  ;;  %v1126_v6 = vld [vmem:[%s1506_s1 + $0xc8] sm:$0xff]   ;;  %v1130_v10 = vld [vmem:[%s1506_s1 + $0xd0] sm:$0xff]  }
   0x4   :  { %v1123_v3 = vld [vmem:[%s1506_s1 + $0x80] sm:$0xff]   ;;  %999 = vmatprep.subr.bf16.mxu1 %v1122_v2  ;;  %979 = vmatprep.subr.bf16.mxu0 %v1124_v4  ;;  %v1127_v7 = vld [vmem:[%s1506_s1 + $0x88] sm:$0xff]   ;;  %v1131_v11 = vld [vmem:[%s1506_s1 + $0x90] sm:$0xff]  }
   0x5   :  { %1000 = vmatpush3.bf16.msra.mxu1 %v1123_v3  ;;  %v1132_v12 = vld [vmem:[%s1506_s1 + $0x58] sm:$0xff]   ;;  %v1136_v16 = vld [vmem:[%s1506_s1 + $0x60] sm:$0xff]   ;;  %v1140_v20 = vld [vmem:[%s1506_s1 + $0x68] sm:$0xff]  }
   0x6   :  { %1001 = vmatprep.subr.bf16.mxu1 %v1126_v6  ;;  %v1133_v13 = vld [vmem:[%s1506_s1 + $0x18] sm:$0xff]   ;;  %v1137_v17 = vld [vmem:[%s1506_s1 + $0x20] sm:$0xff]   ;;  %v1141_v21 = vld [vmem:[%s1506_s1 + $0x28] sm:$0xff]  }
   0x7   :  { %980 = vmatpush3.bf16.msra.mxu0 %v1125_v5  ;;  %v1134_v14 = vld [vmem:[%s1506_s1 + $0xd8] sm:$0xff]   ;;  %v1138_v18 = vld [vmem:[%s1506_s1 + $0xe0] sm:$0xff]   ;;  %v1142_v22 = vld [vmem:[%s1506_s1 + $0xe8] sm:$0xff]  }
   0x8   :  { %981 = vmatprep.subr.bf16.mxu0 %v1128_v8  ;;  %v1135_v15 = vld [vmem:[%s1506_s1 + $0x98] sm:$0xff]   ;;  %v1139_v19 = vld [vmem:[%s1506_s1 + $0xa0] sm:$0xff]   ;;  %v1143_v23 = vld [vmem:[%s1506_s1 + $0xa8] sm:$0xff]  }
   0x9   :  { %1002 = vmatpush3.bf16.msra.mxu1 %v1127_v7  ;;  %v1144_v24 = vld [vmem:[%s1506_s1 + $0x70] sm:$0xff]   ;;  %v1148_v28 = vld [vmem:[%s1506_s1 + $0x78] sm:$0xff]   ;;  %v1153_v32 = vld [vmem:[%s1507_s0 + $0x4] ss:$28 sps:$4 sm:$0xff]  }
   0xa   :  { %1003 = vmatprep.subr.bf16.mxu1 %v1130_v10  ;;  %v1145_v25 = vld [vmem:[%s1506_s1 + $0x30] sm:$0xff]   ;;  %v1149_v29 = vld [vmem:[%s1506_s1 + $0x38] sm:$0xff]   ;;  %558 = vmatprep.mubr.bf16.mxu0 %v1153_v32  ;;  %v1155_v34 = vld [vmem:[%s1506_s1 + $0x140] sm:$0xff]  }
   0xb   :  { %982 = vmatpush3.bf16.msra.mxu0 %v1129_v9  ;;  %v1146_v26 = vld [vmem:[%s1506_s1 + $0xf0] sm:$0xff]   ;;  %v1150_v30 = vld [vmem:[%s1506_s1 + $0xf8] sm:$0xff]   ;;  %v1156_v35 = vld [vmem:[%s1507_s0 + $0x8] ss:$28 sps:$4 sm:$0xff]  }
   0xc   :  { %983 = vmatprep.subr.bf16.mxu0 %v1132_v12  ;;  %v1147_v27 = vld [vmem:[%s1506_s1 + $0xb0] sm:$0xff]   ;;  %v1151_v31 = vld [vmem:[%s1507_s0] ss:$28 sps:$4 sm:$0xff]   ;;  %v1158_v36 = vld [vmem:[%s1507_s0 + $0xc] ss:$28 sps:$4 sm:$0xff]  }
   0xd   :  { %1004 = vmatpush3.bf16.msra.mxu1 %v1131_v11  ;;  %v1154_v33 = vld [vmem:[%s1506_s1 + $0xb8] sm:$0xff]   ;;  %v1159_v37 = vld [vmem:[%s1506_s1 + $0x100] sm:$0xff]   ;;  %599 = vmatprep.mubr.bf16.mxu1 %v1158_v36  ;;  %v1161_v40 = vld [vmem:[%s1506_s1 + $0x148] sm:$0xff]  }
   0xe   :  { %1005 = vmatprep.subr.bf16.mxu1 %v1134_v14  ;;  %v1160_v39 = vld [vmem:[%s1506_s1 + $0x180] sm:$0xff]   ;;  %v1162_v41 = vld [vmem:[%s1506_s1 + $0x108] sm:$0xff]   ;;  %v1164_v43 = vld [vmem:[%s1506_s1 + $0x150] sm:$0xff]  }
   0xf   :  { %984 = vmatpush3.bf16.msra.mxu0 %v1133_v13  ;;  %v1163_v42 = vld [vmem:[%s1506_s1 + $0x188] sm:$0xff]   ;;  %v1165_v44 = vld [vmem:[%s1506_s1 + $0x110] sm:$0xff]   ;;  %v1167_v46 = vld [vmem:[%s1506_s1 + $0x158] sm:$0xff]  }
  0x10   :  { %985 = vmatprep.subr.bf16.mxu0 %v1136_v16  ;;  %v1166_v45 = vld [vmem:[%s1506_s1 + $0x190] sm:$0xff]   ;;  %v1168_v47 = vld [vmem:[%s1506_s1 + $0x118] sm:$0xff]   ;;  %v1170_v49 = vld [vmem:[%s1506_s1 + $0x160] sm:$0xff]  }
  0x11   :  { %1006 = vmatpush3.bf16.msra.mxu1 %v1135_v15  ;;  %v1169_v48 = vld [vmem:[%s1506_s1 + $0x198] sm:$0xff]   ;;  %v1171_v50 = vld [vmem:[%s1506_s1 + $0x120] sm:$0xff]   ;;  %v1173_v52 = vld [vmem:[%s1506_s1 + $0x168] sm:$0xff]  }
  0x12   :  { %1007 = vmatprep.subr.bf16.mxu1 %v1138_v18  ;;  %v1172_v51 = vld [vmem:[%s1506_s1 + $0x1a0] sm:$0xff]   ;;  %v1174_v53 = vld [vmem:[%s1506_s1 + $0x128] sm:$0xff]   ;;  %v1176_v55 = vld [vmem:[%s1506_s1 + $0x170] sm:$0xff]  }
  0x13   :  { %986 = vmatpush3.bf16.msra.mxu0 %v1137_v17  ;;  %v1175_v54 = vld [vmem:[%s1506_s1 + $0x1a8] sm:$0xff]   ;;  %v1177_v56 = vld [vmem:[%s1506_s1 + $0x130] sm:$0xff]   ;;  %v1179_v59 = vld [vmem:[%s1506_s1 + $0x178] sm:$0xff]  }
  0x14   :  { %987 = vmatprep.subr.bf16.mxu0 %v1140_v20  ;;  %v1178_v57 = vld [vmem:[%s1506_s1 + $0x1b0] sm:$0xff]   ;;  %v1180_v60 = vld [vmem:[%s1506_s1 + $0x138] sm:$0xff]   ;;  %v1186_v0 = vld [vmem:[%s1508_s3] sm:$0xff]  }
  0x15   :  { %1008 = vmatpush3.bf16.msra.mxu1 %v1139_v19  ;;  %v1183_v58 = vld [vmem:[%s1507_s0 + $0x14] ss:$28 sps:$4 sm:$0xff]   ;;  %v1184_v61 = vld [vmem:[%s1506_s1 + $0x1b8] sm:$0xff]   ;;  %v1187_v1 = vld [vmem:[%s1508_s3 + $0x8] sm:$0xff]  }
  0x16   :  { %1009 = vmatprep.subr.bf16.mxu1 %v1142_v22  ;;  %v1181_v62 = vld [vmem:[%s1507_s0 + $0x10] ss:$28 sps:$4 sm:$0xff]   ;;  %v1185_v63 = vld [vmem:[%s1507_s0 + $0x18] ss:$28 sps:$4 sm:$0xff]   ;;  %v1190_v4 = vld [vmem:[%s1508_s3 + $0x20] sm:$0xff]  }
  0x17   :  { %988 = vmatpush3.bf16.msra.mxu0 %v1141_v21  ;;  %v1188_v2 = vld [vmem:[%s1508_s3 + $0x10] sm:$0xff]   ;;  %v1189_v3 = vld [vmem:[%s1508_s3 + $0x18] sm:$0xff]   ;;  %v1191_v5 = vld [vmem:[%s1508_s3 + $0x28] sm:$0xff]  }
  0x18   :  { %989 = vmatprep.subr.bf16.mxu0 %v1144_v24  ;;  %v1192_v6 = vld [vmem:[%s1508_s3 + $0x30] sm:$0xff]   ;;  %v1193_v7 = vld [vmem:[%s1508_s3 + $0x38] sm:$0xff]   ;;  %v1194_v8 = vld [vmem:[%s1509_s5] sm:$0xff]  }
  0x19   :  { %1010 = vmatpush3.bf16.msra.mxu1 %v1143_v23  ;;  %v1195_v9 = vld [vmem:[%s1509_s5 + $0x8] sm:$0xff]   ;;  %v898_v11 = vld [vmem:[%s1510_s2] ss:$0 sm:$0xff] }
  0x1a   :  { %1011 = vmatprep.subr.bf16.mxu1 %v1146_v26 }
  0x1b   :  { %990 = vmatpush3.bf16.msra.mxu0 %v1145_v25 }
  0x1c   :  { %991 = vmatprep.subr.bf16.mxu0 %v1148_v28 }
  0x1d   :  { %1012 = vmatpush3.bf16.msra.mxu1 %v1147_v27 }
  0x1e   :  { %1013 = vmatprep.subr.bf16.mxu1 %v1150_v30 }
  0x1f   :  { %992 = vmatpush3.bf16.msra.mxu0 %v1149_v29 }
  0x20   :  { %1021 = vmatprep.subr.bf16.mxu0 %v1155_v34 }
  0x21   :  { %1014 = vmatpush3.bf16.msra.mxu1 %v1154_v33 }
  0x22   :  { %559 = vmatmul.mubr.bf16.vlgmr.msra.gmra.mrb[0].mxu0 %v1151_v31  ;;  %1066 = vmatprep.subr.bf16.mxu1 %v1198_v38 }
  0x23   :  { %1022 = vmatpush3.bf16.msra.mxu0 %v1159_v37  ;;  %640 = vmatprep.mubr.bf16.mxu0 %v1183_v58 }
  0x24   :  { %600 = vmatmul.mubr.bf16.vlgmr.msra.gmra.mrb[0].mxu1 %v1156_v35  ;;  %1023 = vmatprep.subr.bf16.mxu0 %v1161_v40 }
  0x25   :  { %1067 = vmatpush3.bf16.msra.mxu1 %v1160_v39  ;;  %1082 = vmatprep.mubr.msk.bf16.mxu1 %vm1199_vm0, %v1198_v38 }
  0x26   :  { %1068 = vmatprep.subr.bf16.mxu1 %v1198_v38 }
  0x27   :  { %1024 = vmatpush3.bf16.msra.mxu0 %v1162_v41 }
  0x28   :  { %1025 = vmatprep.subr.bf16.mxu0 %v1164_v43 }
  0x29   :  { %1069 = vmatpush3.bf16.msra.mxu1 %v1163_v42 }
  0x2a   :  { %1070 = vmatprep.subr.bf16.mxu1 %v1198_v38 }
  0x2b   :  { %1026 = vmatpush3.bf16.msra.mxu0 %v1165_v44 }
  0x2c   :  { %1027 = vmatprep.subr.bf16.mxu0 %v1167_v46  ;;  %v1197_v46 = vld [vmem:[%s1509_s5 + $0x18] sm:$0xff]  }
  0x2d   :  { %1071 = vmatpush3.bf16.msra.mxu1 %v1166_v45  ;;  %v1196_v45 = vld [vmem:[%s1509_s5 + $0x10] sm:$0xff]  }
  0x2e   :  { %1072 = vmatprep.subr.bf16.mxu1 %v1198_v38 }
  0x2f   :  { %1028 = vmatpush3.bf16.msra.mxu0 %v1168_v47  ;;  %v962_v47 = vld [vmem:[%s1511_s4] ss:$0 sm:$0xff] }
  0x30   :  { %1029 = vmatprep.subr.bf16.mxu0 %v1170_v49 }
  0x31   :  { %1073 = vmatpush3.bf16.msra.mxu1 %v1169_v48 }
  0x32   :  { %1074 = vmatprep.subr.bf16.mxu1 %v1198_v38 }
  0x33   :  { %1030 = vmatpush3.bf16.msra.mxu0 %v1171_v50 }
  0x34   :  { %1031 = vmatprep.subr.bf16.mxu0 %v1173_v52 }
  0x35   :  { %1075 = vmatpush3.bf16.msra.mxu1 %v1172_v51 }
  0x36   :  { %1076 = vmatprep.subr.bf16.mxu1 %v1198_v38 }
  0x37   :  { %1032 = vmatpush3.bf16.msra.mxu0 %v1174_v53 }
  0x38   :  { %1033 = vmatprep.subr.bf16.mxu0 %v1176_v55 }
  0x39   :  { %1077 = vmatpush3.bf16.msra.mxu1 %v1175_v54 }
  0x3a   :  { %1078 = vmatprep.subr.bf16.mxu1 %v1198_v38 }
  0x3b   :  { %1034 = vmatpush3.bf16.msra.mxu0 %v1177_v56 }
  0x3c   :  { %1035 = vmatprep.subr.bf16.mxu0 %v1179_v59 }
  0x3d   :  { %1079 = vmatpush3.bf16.msra.mxu1 %v1178_v57 }
  0x3e   :  { %1080 = vmatprep.subr.bf16.mxu1 %v1198_v38 }
  0x3f   :  { %1036 = vmatpush3.bf16.msra.mxu0 %v1180_v60 }
  0x40   :  { %1086 = vmatprep.subr.bf16.mxu0 %v1198_v38 }
  0x41   :  { %1081 = vmatpush3.bf16.msra.mxu1 %v1184_v61 }
  0x42   :  { %1106 = vmatprep.subr.bf16.mxu1 %v1198_v38  ;;  %641 = vmatmul.mubr.bf16.vlgmr.msra.gmra.mrb[4].mxu0 %v1181_v62 }
  0x43   :  { %1102 = vmatprep.mubr.msk.bf16.mxu0 %vm1199_vm0, %v1198_v38  ;;  %1087 = vmatpush3.bf16.msra.mxu0 %v1186_v0 }
  0x44   :  { %1083 = vmatmul.mubr.bf16.vlgmr.msra.gmra.mrb[4].mxu1 %v1185_v63  ;;  %1088 = vmatprep.subr.bf16.mxu0 %v1198_v38 }
  0x45   :  { %1114 = vmatprep.mubr.msk.bf16.mxu1 %vm1199_vm0, %v1198_v38  ;;  %1107 = vmatpush3.bf16.msra.mxu1 %v1194_v8 }
  0x46   :  { %1108 = vmatprep.subr.bf16.mxu1 %v1198_v38 }
  0x47   :  { %1089 = vmatpush3.bf16.msra.mxu0 %v1187_v1 }
  0x48   :  { %1090 = vmatprep.subr.bf16.mxu0 %v1198_v38 }
  0x49   :  { %1109 = vmatpush3.bf16.msra.mxu1 %v1195_v9 }
  0x4a   :  { %1110 = vmatprep.subr.bf16.mxu1 %v1198_v38 }
  0x4b   :  { %1091 = vmatpush3.bf16.msra.mxu0 %v1188_v2 }
  0x4c   :  { %1092 = vmatprep.subr.bf16.mxu0 %v1198_v38 }
  0x4d   :  { %1111 = vmatpush3.bf16.msra.mxu1 %v1196_v45 }
  0x4e   :  { %1112 = vmatprep.subr.bf16.mxu1 %v1198_v38 }
  0x4f   :  { %1093 = vmatpush3.bf16.msra.mxu0 %v1189_v3 }
  0x50   :  { %1094 = vmatprep.subr.bf16.mxu0 %v1198_v38 }
  0x51   :  { %1113 = vmatpush3.bf16.msra.mxu1 %v1197_v46 }
  0x53   :  { %1095 = vmatpush3.bf16.msra.mxu0 %v1190_v4 }
  0x54   :  { %1096 = vmatprep.subr.bf16.mxu0 %v1198_v38 }
  0x57   :  { %1097 = vmatpush3.bf16.msra.mxu0 %v1191_v5 }
  0x58   :  { %1098 = vmatprep.subr.bf16.mxu0 %v1198_v38 }
  0x5b   :  { %1099 = vmatpush3.bf16.msra.mxu0 %v1192_v6 }
  0x5c   :  { %1100 = vmatprep.subr.bf16.mxu0 %v1198_v38  ;;  %v971_v38 = vld [vmem:[%s1512_s6] ss:$0 sm:$0xff] }
  0x5f   :  { %1101 = vmatpush3.bf16.msra.mxu0 %v1193_v7 }
  0xf5   :  { %v993_v10 = vpop.f32.mrb[0].mxu0 }
  0xf6   :  { %v994_v12 = vpop.f32.mrb[1].mxu0 }
  0xf7   :  { %v995_v13 = vadd.f32 %v994_v12, %v993_v10  ;;  %v996_v14 = vpop.f32.mrb[2].mxu0  ;;  %v1015_v15 = vpop.f32.mrb[0].mxu1 }
  0xf8   :  { %v997_v16 = vpop.f32.mrb[3].mxu0  ;;  %v1016_v19 = vpop.f32.mrb[1].mxu1 }
  0xf9   :  { %v561_v17 = vadd.f32 %v995_v13, %v898_v11  ;;  %v998_v18 = vadd.f32 %v997_v16, %v996_v14  ;;  %v1017_v20 = vadd.f32 %v1016_v19, %v1015_v15  ;;  %v1018_v21 = vpop.f32.mrb[2].mxu1 }
  0xfa   :  { %v1019_v23 = vpop.f32.mrb[3].mxu1 }
  0xfb   :  { %v564_v22 = vadd.f32 %v998_v18, %v898_v11  ;;  %v602_v24 = vadd.f32 %v1017_v20, %v561_v17  ;;  %v1020_v25 = vadd.f32 %v1019_v23, %v1018_v21 }
  0xfd   :  { %v605_v26 = vadd.f32 %v1020_v25, %v564_v22 }
 0x115   :  { %v1037_v27 = vpop.f32.mrb[4].mxu0 }
 0x116   :  { %v1038_v28 = vpop.f32.mrb[5].mxu0 }
 0x117   :  { %v683_v29 = vpop.f32.mrb[4].mxu1  ;;  %v1039_v30 = vadd.f32 %v1038_v28, %v1037_v27  ;;  %v1040_v31 = vpop.f32.mrb[6].mxu0 }
 0x118   :  { %v1084_v32 = vpop.f32.mrb[5].mxu1  ;;  %v1041_v33 = vpop.f32.mrb[7].mxu0 }
 0x119   :  { %v686_v34 = vpop.f32.mrb[6].mxu1  ;;  %v643_v35 = vadd.f32 %v1039_v30, %v602_v24  ;;  %v1042_v36 = vadd.f32 %v1041_v33, %v1040_v31 }
 0x11a   :  { %v1085_v37 = vpop.f32.mrb[7].mxu1 }
 0x11b   :  { %v684_v39 = vadd.f32 %v683_v29, %v643_v35  ;;  %v646_v40 = vadd.f32 %v1042_v36, %v605_v26 }
 0x11d   :  { %v687_v41 = vadd.f32 %v686_v34, %v646_v40  ;;  %v690_v42 = vmax.f32 %v684_v39, 0.0 }
 0x11f   :  { %v691_v43 = vmax.f32 %v687_v41, 0.0 }
 0x121   :  { %v692_v44 = vpack.c.bf16 %v691_v43, %v690_v42 }
 0x123   :  { %1103 = vmatmul.mubr.bf16.vlgmr.msra.gmra.mrb[8].mxu0 %v692_v44 }
 0x1f6   :  { %v798_v48 = vpop.f32.mrb[8].mxu0 }
 0x1f7   :  { %v799_v49 = vadd.f32 %v962_v47, %v798_v48  ;;  %v1104_v50 = vpop.f32.mrb[9].mxu0 }
 0x1f8   :  { %v801_v51 = vpop.f32.mrb[10].mxu0 }
 0x1f9   :  { %v802_v52 = vadd.f32 %v962_v47, %v801_v51  ;;  %v1105_v53 = vpop.f32.mrb[11].mxu0  ;;  %v805_v54 = vmax.f32 %v799_v49, 0.0 }
 0x1fb   :  { %v806_v55 = vmax.f32 %v802_v52, 0.0 }
 0x1fd   :  { %v807_v56 = vpack.c.bf16 %v806_v55, %v805_v54 }
 0x1ff   :  { %1115 = vmatmul.mubr.msk.bf16.vlgmr.msra.gmra.mrb[8].mxu1 %vm847_vm1, %v807_v56 }
 0x2d2   :  { %v885_v57 = vpop.f32.mrb[8].mxu1 }
 0x2d3   :  { %v886_v58 = vadd.f32 %v971_v38, %v885_v57  ;;  %v1116_v59 = vpop.f32.mrb[9].mxu1 }
 0x2d4   :  { %v888_v60 = vpop.f32.mrb[10].mxu1 }
 0x2d5   :  { %892 = vst [vmem:[%s1513_s7] sm:$0xff] %v886_v58  ;;  %v889_v61 = vadd.f32 %v971_v38, %v888_v60  ;;  %v1117_v62 = vpop.f32.mrb[11].mxu1 }
 0x2d7   :  { %893 = vst [vmem:[%s1513_s7 + $0x8] sm:$0xff] %v889_v61 }

</bundles_post_ra>
